<compile_context>
chip_gen: v7x
topology: tpu7x:2x2x1
jax: 0.10.0
libtpu: 0.0.40
codegen_flags: <defaults>
</compile_context>

<pallas_src>
import functools
import math

import jax
import jax.numpy as jnp
from jax.experimental import pallas as pl
from jax.experimental.pallas import tpu as pltpu


def _re_block_kernel(x_ref, w_ref, sm_ref, se1_ref, out_ref, *, offsets, C, C8, L):
    x = x_ref[...]                                               # (C, L) lane-dense slab

    # Hoisted lane index + per-tap zero-padding masks (shared by both convs).
    li = jax.lax.broadcasted_iota(jnp.int32, (C, L), 1)
    masks = []
    for o in offsets:
        if o == 0:
            masks.append(None)
        elif o < 0:
            masks.append(li >= -o)                               # zero-pad left
        else:
            masks.append(li < L - o)                             # zero-pad right

    def conv(v, layer):
        # im2col: k masked lane rotations stacked along sublanes, then one MXU matmul
        # with the flattened (C, k*C) folded (conv + eval-BN) weights.
        taps = []
        for o, m in zip(offsets, masks):
            s = v if o == 0 else pltpu.roll(v, shift=(-o) % L, axis=1)
            if m is not None:
                s = jnp.where(m, s, 0.0)
            taps.append(s)
        patches = jnp.concatenate(taps, axis=0)                  # (k*C, L)
        w = w_ref[layer]                                         # (C, k*C)
        b = sm_ref[:, layer:layer + 1]                           # (C, 1) folded bias
        return jnp.dot(w, patches, preferred_element_type=jnp.float32) + b

    # cbr1 / cbr2: Conv1d + (folded eval-mode) BatchNorm + ReLU
    h = jnp.maximum(conv(x, 0), 0.0)
    h = jnp.maximum(conv(h, 1), 0.0)

    # se_block: global average pool -> 1x1 conv -> ReLU -> 1x1 conv -> sigmoid ->
    # additive excitation (the module uses torch.add, not multiply).
    pooled = jnp.mean(h, axis=1, keepdims=True)                  # (C, 1)
    sew1 = se1_ref[:, :C]                                        # (C8, C)
    seb1 = se1_ref[:, C:C + 1]                                   # (C8, 1)
    z = jnp.maximum(
        jnp.dot(sew1, pooled, preferred_element_type=jnp.float32) + seb1, 0.0)
    sew2 = sm_ref[:, 3:3 + C8]                                   # (C, C8)
    seb2 = sm_ref[:, 2:3]                                        # (C, 1)
    se = jax.nn.sigmoid(
        jnp.dot(sew2, z, preferred_element_type=jnp.float32) + seb2)

    # re_block residual: x + seblock(cbr2(cbr1(x)))  (se broadcasts across lanes)
    out_ref[...] = (x + h + se).astype(out_ref.dtype)


def re_block_forward(x_bcl, params, *, kernel_size, dilation, eps=1e-5):
    B, C, L = x_bcl.shape
    k = kernel_size
    pad = 3                                          # hard-coded in conbr_block
    assert dilation * (k - 1) == 2 * pad, "re_block residual requires a length-preserving conv"
    offsets = tuple(t * dilation - pad for t in range(k))
    C8 = params["se1_w"].shape[0]
    kC = k * C

    def fold(wk, bk, g, beta, m, v):
        # Fold eval-mode BN (scale/shift) into the conv weights & bias.
        scale = g / jnp.sqrt(v + eps)
        wf = jnp.transpose(wk, (0, 2, 1)).reshape(wk.shape[0], -1) * scale[:, None]
        bf = scale * (bk - m) + beta
        return wf.astype(jnp.float32), bf.astype(jnp.float32)

    w1, b1 = fold(params["conv1_w"], params["conv1_b"],
                  params["bn1_g"], params["bn1_b"], params["bn1_m"], params["bn1_v"])
    w2, b2 = fold(params["conv2_w"], params["conv2_b"],
                  params["bn2_g"], params["bn2_b"], params["bn2_m"], params["bn2_v"])

    # Packed parameter slabs (few DMA descriptors instead of 11 tiny inputs).
    wstack = jnp.stack([w1, w2], axis=0)                                   # (2, C, k*C)
    small = jnp.concatenate(                                               # (C, 3+C8)
        [b1[:, None], b2[:, None],
         params["se2_b"].reshape(C, 1).astype(jnp.float32),
         params["se2_w"].reshape(C, C8).astype(jnp.float32)], axis=1)
    se1 = jnp.concatenate(                                                 # (C8, C+1)
        [params["se1_w"].reshape(C8, C).astype(jnp.float32),
         params["se1_b"].reshape(C8, 1).astype(jnp.float32)], axis=1)

    x32 = x_bcl.astype(jnp.float32)

    kernel = functools.partial(_re_block_kernel, offsets=offsets, C=C, C8=C8, L=L)

    flops = 2 * B * (2 * C * kC * L) + 4 * B * C8 * C + 8 * B * C * L
    bytes_accessed = 2 * B * C * L * 4 + 4 * (2 * C * kC + C * (3 + C8) + C8 * (C + 1))

    return pl.pallas_call(
        kernel,
        out_shape=jax.ShapeDtypeStruct((B, C, L), jnp.float32),
        grid=(B,),
        in_specs=[
            pl.BlockSpec((None, C, L), lambda b: (b, 0, 0)),     # x: one batch per grid step
            pl.BlockSpec((2, C, kC), lambda b: (0, 0, 0)),       # folded conv weights
            pl.BlockSpec((C, 3 + C8), lambda b: (0, 0)),         # biases + se conv2
            pl.BlockSpec((C8, C + 1), lambda b: (0, 0)),         # se conv1 weight|bias
        ],
        out_specs=pl.BlockSpec((None, C, L), lambda b: (b, 0, 0)),
        input_output_aliases={0: 0},
        cost_estimate=pl.CostEstimate(flops=flops, transcendentals=B * C,
                                      bytes_accessed=bytes_accessed),
        compiler_params=pltpu.CompilerParams(dimension_semantics=("parallel",)),
    )(x32, wstack, small, se1)


def re_block_reference(x, params, *, kernel_size, dilation, eps=1e-5):
    # Plain-JAX reference mirroring the PyTorch module in eval mode.
    def conv(x, w, b):
        y = jax.lax.conv_general_dilated(
            x, w, window_strides=(1,), padding=((3, 3),), rhs_dilation=(dilation,),
            dimension_numbers=("NCH", "OIH", "NCH"),
            precision=jax.lax.Precision.HIGHEST)
        return y + b[None, :, None]

    def bn(x, g, beta, m, v):
        return ((x - m[None, :, None]) / jnp.sqrt(v[None, :, None] + eps)
                * g[None, :, None] + beta[None, :, None])

    def cbr(x, wk, bk, g, beta, m, v):
        return jax.nn.relu(bn(conv(x, wk, bk), g, beta, m, v))

    h = cbr(x, params["conv1_w"], params["conv1_b"],
            params["bn1_g"], params["bn1_b"], params["bn1_m"], params["bn1_v"])
    h = cbr(h, params["conv2_w"], params["conv2_b"],
            params["bn2_g"], params["bn2_b"], params["bn2_m"], params["bn2_v"])

    se = jnp.mean(h, axis=2, keepdims=True)                                   # (B, C, 1)
    se = jax.nn.relu(jnp.einsum("oc,bci->boi", params["se1_w"][:, :, 0], se,
                                precision=jax.lax.Precision.HIGHEST)
                     + params["se1_b"][None, :, None])
    se = jax.nn.sigmoid(jnp.einsum("oc,bci->boi", params["se2_w"][:, :, 0], se,
                                   precision=jax.lax.Precision.HIGHEST)
                        + params["se2_b"][None, :, None])
    return x + (h + se)


if __name__ == "__main__":
    # in_layer == out_layer (required for re_block's residual add); out_layer >= 8 for the SE
    # bottleneck; kernel_size=7, dilation=1 matches the hard-coded padding=3; L=128 keeps the
    # lane axis fully dense.
    B, C, L = 2, 16, 128
    kernel_size, dilation = 7, 1
    C8 = C // 8

    key = jax.random.PRNGKey(0)
    keys = jax.random.split(key, 17)

    def u(k, shape, fan_in):
        bound = 1.0 / math.sqrt(fan_in)
        return jax.random.uniform(k, shape, jnp.float32, -bound, bound)

    x = jax.random.normal(keys[0], (B, C, L), jnp.float32)

    params = {
        "conv1_w": u(keys[1], (C, C, kernel_size), C * kernel_size),
        "conv1_b": u(keys[2], (C,), C * kernel_size),
        "bn1_g": 1.0 + 0.1 * jax.random.normal(keys[3], (C,), jnp.float32),
        "bn1_b": 0.1 * jax.random.normal(keys[4], (C,), jnp.float32),
        "bn1_m": 0.1 * jax.random.normal(keys[5], (C,), jnp.float32),
        "bn1_v": jax.random.uniform(keys[6], (C,), jnp.float32, 0.5, 1.5),
        "conv2_w": u(keys[7], (C, C, kernel_size), C * kernel_size),
        "conv2_b": u(keys[8], (C,), C * kernel_size),
        "bn2_g": 1.0 + 0.1 * jax.random.normal(keys[9], (C,), jnp.float32),
        "bn2_b": 0.1 * jax.random.normal(keys[10], (C,), jnp.float32),
        "bn2_m": 0.1 * jax.random.normal(keys[11], (C,), jnp.float32),
        "bn2_v": jax.random.uniform(keys[12], (C,), jnp.float32, 0.5, 1.5),
        "se1_w": u(keys[13], (C8, C, 1), C),
        "se1_b": u(keys[14], (C8,), C),
        "se2_w": u(keys[15], (C, C8, 1), C8),
        "se2_b": u(keys[16], (C,), C8),
    }

    fwd = jax.jit(functools.partial(re_block_forward,
                                    kernel_size=kernel_size, dilation=dilation))
    out = jax.block_until_ready(fwd(x, params))

    ref = re_block_reference(x, params, kernel_size=kernel_size, dilation=dilation)
    err = float(jnp.max(jnp.abs(out - ref)))
    assert err < 1e-3, f"max abs error {err}"
    print("KERNEL_OK")
</pallas_src>

<mosaic_0001>
module attributes {stable_mosaic.version = 11 : i64} {
  func.func @_re_block_kernel(%arg0: i32, %arg1: memref<1x16x128xf32, #tpu.memory_space<vmem>>, %arg2: memref<2x16x112xf32, #tpu.memory_space<vmem>>, %arg3: memref<16x5xf32, #tpu.memory_space<vmem>>, %arg4: memref<2x17xf32, #tpu.memory_space<vmem>>, %arg5: memref<1x16x128xf32, #tpu.memory_space<vmem>>) attributes {dimension_semantics = [#tpu.dimension_semantics<parallel>], iteration_bounds = array<i64: 2>, scalar_prefetch = 0 : i64, scratch_operands = 0 : i64, tpu.core_type = #tpu.core_type<tc>, window_params = [{transform_indices = @transform_0, window_bounds = array<i64: 1, 16, 128>}, {pipeline_mode = #tpu.pipeline_mode<synchronous>, transform_indices = @transform_1, window_bounds = array<i64: 2, 16, 112>}, {pipeline_mode = #tpu.pipeline_mode<synchronous>, transform_indices = @transform_2, window_bounds = array<i64: 16, 5>}, {pipeline_mode = #tpu.pipeline_mode<synchronous>, transform_indices = @transform_3, window_bounds = array<i64: 2, 17>}, {transform_indices = @transform_4, window_bounds = array<i64: 1, 16, 128>}]} {
    %c0 = arith.constant 0 : index
    %c0_0 = arith.constant 0 : index
    %c0_1 = arith.constant 0 : index
    %0 = vector.load %arg1[%c0, %c0_0, %c0_1] : memref<1x16x128xf32, #tpu.memory_space<vmem>>, vector<1x16x128xf32>
    %1 = vector.shape_cast %0 : vector<1x16x128xf32> to vector<16x128xf32>
    %2 = tpu.iota {dimensions = array<i32: 1>} : vector<16x128xi32>
    %c3_i32 = arith.constant 3 : i32
    %3 = vector.broadcast %c3_i32 : i32 to vector<16x128xi32>
    %4 = arith.cmpi sge, %2, %3 : vector<16x128xi32>
    %c2_i32 = arith.constant 2 : i32
    %5 = vector.broadcast %c2_i32 : i32 to vector<16x128xi32>
    %6 = arith.cmpi sge, %2, %5 : vector<16x128xi32>
    %c1_i32 = arith.constant 1 : i32
    %7 = vector.broadcast %c1_i32 : i32 to vector<16x128xi32>
    %8 = arith.cmpi sge, %2, %7 : vector<16x128xi32>
    %c127_i32 = arith.constant 127 : i32
    %9 = vector.broadcast %c127_i32 : i32 to vector<16x128xi32>
    %10 = arith.cmpi slt, %2, %9 : vector<16x128xi32>
    %c126_i32 = arith.constant 126 : i32
    %11 = vector.broadcast %c126_i32 : i32 to vector<16x128xi32>
    %12 = arith.cmpi slt, %2, %11 : vector<16x128xi32>
    %c125_i32 = arith.constant 125 : i32
    %13 = vector.broadcast %c125_i32 : i32 to vector<16x128xi32>
    %14 = arith.cmpi slt, %2, %13 : vector<16x128xi32>
    %c3_i32_2 = arith.constant 3 : i32
    %15 = tpu.dynamic_rotate %1 by %c3_i32_2 dim 1 : vector<16x128xf32>, i32 -> vector<16x128xf32>
    %cst = arith.constant 0.000000e+00 : f32
    %16 = vector.broadcast %cst : f32 to vector<16x128xf32>
    %17 = arith.select %4, %15, %16 : vector<16x128xi1>, vector<16x128xf32>
    %c2_i32_3 = arith.constant 2 : i32
    %18 = tpu.dynamic_rotate %1 by %c2_i32_3 dim 1 : vector<16x128xf32>, i32 -> vector<16x128xf32>
    %cst_4 = arith.constant 0.000000e+00 : f32
    %19 = vector.broadcast %cst_4 : f32 to vector<16x128xf32>
    %20 = arith.select %6, %18, %19 : vector<16x128xi1>, vector<16x128xf32>
    %c1_i32_5 = arith.constant 1 : i32
    %21 = tpu.dynamic_rotate %1 by %c1_i32_5 dim 1 : vector<16x128xf32>, i32 -> vector<16x128xf32>
    %cst_6 = arith.constant 0.000000e+00 : f32
    %22 = vector.broadcast %cst_6 : f32 to vector<16x128xf32>
    %23 = arith.select %8, %21, %22 : vector<16x128xi1>, vector<16x128xf32>
    %c127_i32_7 = arith.constant 127 : i32
    %24 = tpu.dynamic_rotate %1 by %c127_i32_7 dim 1 : vector<16x128xf32>, i32 -> vector<16x128xf32>
    %cst_8 = arith.constant 0.000000e+00 : f32
    %25 = vector.broadcast %cst_8 : f32 to vector<16x128xf32>
    %26 = arith.select %10, %24, %25 : vector<16x128xi1>, vector<16x128xf32>
    %c126_i32_9 = arith.constant 126 : i32
    %27 = tpu.dynamic_rotate %1 by %c126_i32_9 dim 1 : vector<16x128xf32>, i32 -> vector<16x128xf32>
    %cst_10 = arith.constant 0.000000e+00 : f32
    %28 = vector.broadcast %cst_10 : f32 to vector<16x128xf32>
    %29 = arith.select %12, %27, %28 : vector<16x128xi1>, vector<16x128xf32>
    %c125_i32_11 = arith.constant 125 : i32
    %30 = tpu.dynamic_rotate %1 by %c125_i32_11 dim 1 : vector<16x128xf32>, i32 -> vector<16x128xf32>
    %cst_12 = arith.constant 0.000000e+00 : f32
    %31 = vector.broadcast %cst_12 : f32 to vector<16x128xf32>
    %32 = arith.select %14, %30, %31 : vector<16x128xi1>, vector<16x128xf32>
    %33 = tpu.concatenate %17, %20, %23, %1, %26, %29, %32 in 0 : vector<16x128xf32>, vector<16x128xf32>, vector<16x128xf32>, vector<16x128xf32>, vector<16x128xf32>, vector<16x128xf32>, vector<16x128xf32> -> vector<112x128xf32>
    %c0_13 = arith.constant 0 : index
    %c0_14 = arith.constant 0 : index
    %c0_15 = arith.constant 0 : index
    %34 = vector.load %arg2[%c0_13, %c0_14, %c0_15] : memref<2x16x112xf32, #tpu.memory_space<vmem>>, vector<1x16x112xf32>
    %35 = vector.shape_cast %34 : vector<1x16x112xf32> to vector<16x112xf32>
    %c0_16 = arith.constant 0 : index
    %c0_17 = arith.constant 0 : index
    %36 = vector.load %arg3[%c0_16, %c0_17] : memref<16x5xf32, #tpu.memory_space<vmem>>, vector<16x1xf32>
    %cst_18 = arith.constant dense<0.000000e+00> : vector<16x128xf32>
    %37 = tpu.matmul %35, %33, %cst_18 {dimension_numbers = #tpu.dot_dimension_numbers<[1], [0], [0], [1], [0, 0, 1, 1], [], []>} : vector<16x112xf32>, vector<112x128xf32>, vector<16x128xf32> -> vector<16x128xf32>
    %38 = vector.broadcast %36 : vector<16x1xf32> to vector<16x128xf32>
    %39 = arith.addf %37, %38 : vector<16x128xf32>
    %cst_19 = arith.constant 0.000000e+00 : f32
    %40 = vector.broadcast %cst_19 : f32 to vector<16x128xf32>
    %41 = arith.maximumf %39, %40 : vector<16x128xf32>
    %c3_i32_20 = arith.constant 3 : i32
    %42 = tpu.dynamic_rotate %41 by %c3_i32_20 dim 1 : vector<16x128xf32>, i32 -> vector<16x128xf32>
    %cst_21 = arith.constant 0.000000e+00 : f32
    %43 = vector.broadcast %cst_21 : f32 to vector<16x128xf32>
    %44 = arith.select %4, %42, %43 : vector<16x128xi1>, vector<16x128xf32>
    %c2_i32_22 = arith.constant 2 : i32
    %45 = tpu.dynamic_rotate %41 by %c2_i32_22 dim 1 : vector<16x128xf32>, i32 -> vector<16x128xf32>
    %cst_23 = arith.constant 0.000000e+00 : f32
    %46 = vector.broadcast %cst_23 : f32 to vector<16x128xf32>
    %47 = arith.select %6, %45, %46 : vector<16x128xi1>, vector<16x128xf32>
    %c1_i32_24 = arith.constant 1 : i32
    %48 = tpu.dynamic_rotate %41 by %c1_i32_24 dim 1 : vector<16x128xf32>, i32 -> vector<16x128xf32>
    %cst_25 = arith.constant 0.000000e+00 : f32
    %49 = vector.broadcast %cst_25 : f32 to vector<16x128xf32>
    %50 = arith.select %8, %48, %49 : vector<16x128xi1>, vector<16x128xf32>
    %c127_i32_26 = arith.constant 127 : i32
    %51 = tpu.dynamic_rotate %41 by %c127_i32_26 dim 1 : vector<16x128xf32>, i32 -> vector<16x128xf32>
    %cst_27 = arith.constant 0.000000e+00 : f32
    %52 = vector.broadcast %cst_27 : f32 to vector<16x128xf32>
    %53 = arith.select %10, %51, %52 : vector<16x128xi1>, vector<16x128xf32>
    %c126_i32_28 = arith.constant 126 : i32
    %54 = tpu.dynamic_rotate %41 by %c126_i32_28 dim 1 : vector<16x128xf32>, i32 -> vector<16x128xf32>
    %cst_29 = arith.constant 0.000000e+00 : f32
    %55 = vector.broadcast %cst_29 : f32 to vector<16x128xf32>
    %56 = arith.select %12, %54, %55 : vector<16x128xi1>, vector<16x128xf32>
    %c125_i32_30 = arith.constant 125 : i32
    %57 = tpu.dynamic_rotate %41 by %c125_i32_30 dim 1 : vector<16x128xf32>, i32 -> vector<16x128xf32>
    %cst_31 = arith.constant 0.000000e+00 : f32
    %58 = vector.broadcast %cst_31 : f32 to vector<16x128xf32>
    %59 = arith.select %14, %57, %58 : vector<16x128xi1>, vector<16x128xf32>
    %60 = tpu.concatenate %44, %47, %50, %41, %53, %56, %59 in 0 : vector<16x128xf32>, vector<16x128xf32>, vector<16x128xf32>, vector<16x128xf32>, vector<16x128xf32>, vector<16x128xf32>, vector<16x128xf32> -> vector<112x128xf32>
    %c1 = arith.constant 1 : index
    %c0_32 = arith.constant 0 : index
    %c0_33 = arith.constant 0 : index
    %61 = vector.load %arg2[%c1, %c0_32, %c0_33] : memref<2x16x112xf32, #tpu.memory_space<vmem>>, vector<1x16x112xf32>
    %62 = vector.shape_cast %61 : vector<1x16x112xf32> to vector<16x112xf32>
    %c0_34 = arith.constant 0 : index
    %c1_35 = arith.constant 1 : index
    %63 = vector.load %arg3[%c0_34, %c1_35] : memref<16x5xf32, #tpu.memory_space<vmem>>, vector<16x1xf32>
    %cst_36 = arith.constant dense<0.000000e+00> : vector<16x128xf32>
    %64 = tpu.matmul %62, %60, %cst_36 {dimension_numbers = #tpu.dot_dimension_numbers<[1], [0], [0], [1], [0, 0, 1, 1], [], []>} : vector<16x112xf32>, vector<112x128xf32>, vector<16x128xf32> -> vector<16x128xf32>
    %65 = vector.broadcast %63 : vector<16x1xf32> to vector<16x128xf32>
    %66 = arith.addf %64, %65 : vector<16x128xf32>
    %cst_37 = arith.constant 0.000000e+00 : f32
    %67 = vector.broadcast %cst_37 : f32 to vector<16x128xf32>
    %68 = arith.maximumf %66, %67 : vector<16x128xf32>
    %cst_38 = arith.constant dense<0.000000e+00> : vector<16xf32>
    %69 = vector.multi_reduction <add>, %68, %cst_38 [1] : vector<16x128xf32> to vector<16xf32>
    %70 = vector.shape_cast %69 : vector<16xf32> to vector<16x1xf32>
    %cst_39 = arith.constant 1.280000e+02 : f32
    %71 = vector.broadcast %cst_39 : f32 to vector<16x1xf32>
    %72 = arith.divf %70, %71 : vector<16x1xf32>
    %c0_40 = arith.constant 0 : index
    %c0_41 = arith.constant 0 : index
    %73 = vector.load %arg4[%c0_40, %c0_41] : memref<2x17xf32, #tpu.memory_space<vmem>>, vector<2x16xf32>
    %c0_42 = arith.constant 0 : index
    %c16 = arith.constant 16 : index
    %74 = vector.load %arg4[%c0_42, %c16] : memref<2x17xf32, #tpu.memory_space<vmem>>, vector<2x1xf32>
    %cst_43 = arith.constant dense<0.000000e+00> : vector<2x1xf32>
    %75 = tpu.matmul %73, %72, %cst_43 {dimension_numbers = #tpu.dot_dimension_numbers<[1], [0], [0], [1], [0, 0, 1, 1], [], []>} : vector<2x16xf32>, vector<16x1xf32>, vector<2x1xf32> -> vector<2x1xf32>
    %76 = arith.addf %75, %74 : vector<2x1xf32>
    %cst_44 = arith.constant 0.000000e+00 : f32
    %77 = vector.broadcast %cst_44 : f32 to vector<2x1xf32>
    %78 = arith.maximumf %76, %77 : vector<2x1xf32>
    %c0_45 = arith.constant 0 : index
    %c3 = arith.constant 3 : index
    %79 = vector.load %arg3[%c0_45, %c3] : memref<16x5xf32, #tpu.memory_space<vmem>>, vector<16x2xf32>
    %c0_46 = arith.constant 0 : index
    %c2 = arith.constant 2 : index
    %80 = vector.load %arg3[%c0_46, %c2] : memref<16x5xf32, #tpu.memory_space<vmem>>, vector<16x1xf32>
    %cst_47 = arith.constant dense<0.000000e+00> : vector<16x1xf32>
    %81 = tpu.matmul %79, %78, %cst_47 {dimension_numbers = #tpu.dot_dimension_numbers<[1], [0], [0], [1], [0, 0, 1, 1], [], []>} : vector<16x2xf32>, vector<2x1xf32>, vector<16x1xf32> -> vector<16x1xf32>
    %82 = arith.addf %81, %80 : vector<16x1xf32>
    %83 = arith.negf %82 : vector<16x1xf32>
    %84 = math.exp %83 : vector<16x1xf32>
    %cst_48 = arith.constant 1.000000e+00 : f32
    %85 = vector.broadcast %cst_48 : f32 to vector<16x1xf32>
    %86 = arith.addf %85, %84 : vector<16x1xf32>
    %87 = arith.divf %85, %86 : vector<16x1xf32>
    %88 = arith.addf %1, %68 : vector<16x128xf32>
    %89 = vector.broadcast %87 : vector<16x1xf32> to vector<16x128xf32>
    %90 = arith.addf %88, %89 : vector<16x128xf32>
    %c0_49 = arith.constant 0 : index
    %c0_50 = arith.constant 0 : index
    %c0_51 = arith.constant 0 : index
    %91 = vector.load %arg5[%c0_49, %c0_50, %c0_51] : memref<1x16x128xf32, #tpu.memory_space<vmem>>, vector<1x16x128xf32>
    %92 = vector.shape_cast %91 : vector<1x16x128xf32> to vector<16x128xf32>
    %93 = vector.shape_cast %90 : vector<16x128xf32> to vector<1x16x128xf32>
    tpu.vector_store %arg5[%c0_49, %c0_50, %c0_51], %93 {strides = array<i32>} : memref<1x16x128xf32, #tpu.memory_space<vmem>>, vector<1x16x128xf32>,
    return
  }
  func.func @transform_0(%arg0: i32) -> (i32, i32, i32) {
    %c0_i32 = arith.constant 0 : i32
    %c0_i32_0 = arith.constant 0 : i32
    %c0_i32_1 = arith.constant 0 : i32
    return %arg0, %c0_i32, %c0_i32_0 : i32, i32, i32
  }
  func.func @transform_1(%arg0: i32) -> (i32, i32, i32) {
    %c0_i32 = arith.constant 0 : i32
    %c0_i32_0 = arith.constant 0 : i32
    %c0_i32_1 = arith.constant 0 : i32
    %c0_i32_2 = arith.constant 0 : i32
    return %c0_i32, %c0_i32_0, %c0_i32_1 : i32, i32, i32
  }
  func.func @transform_2(%arg0: i32) -> (i32, i32) {
    %c0_i32 = arith.constant 0 : i32
    %c0_i32_0 = arith.constant 0 : i32
    %c0_i32_1 = arith.constant 0 : i32
    return %c0_i32, %c0_i32_0 : i32, i32
  }
  func.func @transform_3(%arg0: i32) -> (i32, i32) {
    %c0_i32 = arith.constant 0 : i32
    %c0_i32_0 = arith.constant 0 : i32
    %c0_i32_1 = arith.constant 0 : i32
    return %c0_i32, %c0_i32_0 : i32, i32
  }
  func.func @transform_4(%arg0: i32) -> (i32, i32, i32) {
    %c0_i32 = arith.constant 0 : i32
    %c0_i32_0 = arith.constant 0 : i32
    %c0_i32_1 = arith.constant 0 : i32
    return %arg0, %c0_i32, %c0_i32_0 : i32, i32, i32
  }
}

</mosaic_0001>

<bundles_post_ra>
// kernel: re_block_forward.1
= control target key start
LH: loop header
LB: loop body
LE: loop exit
PB: predicated region body
PF: predicated region fallthrough
CT: control target
= control target key end

     0   :  { %9 = vsyncpa [#allocation3], 0  ;;  %s1620_s0 = inlined_call_operand.hbm [shape: f32[2,16,128], index: 0, kind: input, shape index: {}, may-alias: {0,4}]   ;;  %s1621_s1 = inlined_call_operand.vmem [shape: f32[2,16,112], index: 1, kind: input, shape index: {}]   ;;  %s1622_s2 = inlined_call_operand.vmem [shape: f32[16,5], index: 2, kind: input, shape index: {}]   ;;  %s1623_s3 = inlined_call_operand.vmem [shape: f32[2,17], index: 3, kind: input, shape index: {}]   ;;  %s1624_s4 = inlined_call_operand.hbm [shape: f32[2,16,128], index: 4, kind: output, shape index: {}, may-alias: {0,4}]  }
   0x1   :  { %11 = vsyncpa [#allocation3 + $0x1], 0 }
   0x2   :  { %12 = vsyncpa [#allocation4], 0 }
   0x3   :  { %14 = vsyncpa [#allocation4 + $0x1], 0  ;;  %s1309_s15 = smov 0   ;;  %s1311_s16 = smov 0  }
   0x4   :  { %s1313_s17 = smov 0   ;;  %s1315_s18 = smov 0  }
   0x5 LB: > { %s1330_s19 = sadd.s32 4294967295, %s1264_s18   ;;  %s785_s20 = sadd.s32 4294967294, %s1264_s18   ;;  %s1264_s18 = sphi %s1315_s18, %s1649_s18   ;;  %s1260_s17 = sphi %s1313_s17, %s1648_s17   ;;  %s1256_s16 = sphi %s1311_s16, %s1647_s16   ;;  %s1252_s15 = sphi %s1309_s15, %s1646_s15  }
   0x6   : > { %s1334_s21 = sadd.s32 1, %s1264_s18   ;;  %s27_s22 = sadd.s32 1, %s1260_s17 }
   0x7   : > { %s24_s23 = ssub.s32 %s1264_s18, %s1334_s21  ;;  %p34_p0 = scmp.ne.s32.totalorder %s1260_s17, %s1256_s16 }
   0x8   : > { %p25_p1 = scmp.eq.s32.totalorder %s24_s23, 0  ;;  %p35_p2 = scmp.eq.s32.totalorder %s1264_s18, 0 }
   0x9   : > { %p40_p3 = scmp.ne.s32.totalorder %s1256_s16, %s1252_s15  ;;  %p41_p4 = scmp.eq.s32.totalorder %s1330_s19, 0 }
   0xa   : > { %s1346_s24 = scalar_select %p25_p1, %s1260_s17, %s27_s22  }
   0xb   : > { %p1348_p5 = por %p35_p2, %p34_p0  ;;  %p1352_p6 = por %p41_p4, %p40_p3 }
   0xc   : > { %p127_p7 = scmp.eq.s32.totalorder %s1330_s19, 1  ;;  %p133_p8 = scmp.eq.s32.totalorder %s785_s20, 1 }
   0xd   : > { %p1044_p10 = scmp.lt.s32.totalorder %s1264_s18, 2  ;;  %s162_s29 = sand.u32 1, %s1260_s17  }
   0xe   : > { %p1359_p11 = por %p127_p7, %p34_p0  ;;  %p1363_p12 = por %p133_p8, %p40_p3 }
   0xf   : > { %s835_s30 = sshll.u32 %s1264_s18, 8  ;;  %s788_s5 = sshll.u32 %s162_s29, 4 }
  0x10   : > { %s1628_s27 = scalar_select %p1359_p11, 1, 0 }
  0x11   : > { %s1629_s28 = scalar_select %p1363_p12, 1, 0 }
  0x12   : > { %s1372_s8 = scalar_lea.hbm %s1620_s0, %s835_s30  ;;  %s166_s9 = scalar_lea.vmem [#allocation2], %s788_s5 }
  0x13   : > { %s173_s10 = sshll.u32 %s166_s9, 4  ;;  %p1376_p13 = pnand %p1044_p10, %p1348_p5  ;;  %s1380_s10 = int_to_ptr.vmem [resolvable:$true] %s173_s10 }
  0x14   : > { %s1382_s12 = scalar_lea.sflag [#allocation3], %s162_s29  ;;  %s1168_s13 = scalar_lea.hbm %s1372_s8, 256 }
  0x15   : > { %p1169_p0 = scmp.ne.s32.totalorder %s1372_s8, %s1168_s13  ;;  %p1170_p1 = pneg %p1376_p13 }
  0x16   : > { %s1173_s22 = scalar_lea.hbm %s1620_s0, 512  ;;  %p1174_p4 = scmp.lt.u32.totalorder %s1372_s8, %s1620_s0 }
  0x17   : > { %p1171_p2 = pnand %p1170_p1, %p1169_p0  ;;  %p1175_p5 = scmp.lt.u32.totalorder %s1173_s22, %s1168_s13 }
  0x18   : > { %p1177_p8 = scmp.lt.u32.totalorder %s1168_s13, %s1372_s8 }
  0x19   : > { %p1172_p3 = pneg %p1171_p2  ;;  %p1176_p7 = por %p1175_p5, %p1174_p4 }
  0x1b   : > { %p1178_p10 = por %p1177_p8, %p1176_p7 }
  0x1d   : > { %p1179_p9 = pnand %p1178_p10, %p1172_p3 }
  0x1f   : > { %1182 = shalt.err (!%p1179_p9)
}
  0x20   : > { %s1183_s29 = scalar_lea.vmem %s1380_s10, 256  ;;  %s1266_s30 = smov [#allocation2]  }
  0x21   : > { %p1184_p0 = scmp.ne.s32.totalorder %s1380_s10, %s1183_s29  ;;  %s1188_s5 = sshll.u32 %s1266_s30, 4  ;;  %s1189_s5 = int_to_ptr.vmem [resolvable:$false] %s1188_s5 }
  0x22   : > { %s1190_s6 = scalar_lea.vmem %s1189_s5, 512  ;;  %p1191_p11 = scmp.lt.s32.totalorder %s1380_s10, %s1189_s5 }
  0x23   : > { %p1186_p2 = pnand %p1184_p0, %p1170_p1  ;;  %p1192_p4 = scmp.lt.s32.totalorder %s1190_s6, %s1183_s29 }
  0x25   : > { %p1187_p12 = pneg %p1186_p2  ;;  %p1193_p5 = por %p1192_p4, %p1191_p11 }
  0x27   : > { %p1194_p7 = pnand %p1193_p5, %p1187_p12 }
  0x29   : > { %1197 = shalt.err (!%p1194_p7)
}
  0x2a   : > { %s1267_s7 = smov 128   ;;  %s1268_s9 = smov 8  }
  0x2b   : > { %1039 = dma.hbm_to_vmem [thread:$0]  (!%p1376_p13), %s1372_s8, 256, %s1380_s10, %s1382_s12, %s1267_s7, %s1267_s7, %s1268_s9  }
  0x2c   : > { %p791_p9 = scmp.ge.s32.totalorder %s1264_s18, 1  ;;  %p181_p1 = scmp.lt.s32.totalorder %s1264_s18, 3 }
  0x2e   : > { %p182_p3 = pnand %p791_p9, %p181_p1 }
  0x2f   : > { %s1413_s13 = sand.u32 (!%p182_p3), 1, %s1256_s16  }
  0x30   : > { %185 = sbr.rel (%p182_p3) target bundleno = 1542 (0x606), region = 36  ;;  %s792_s14 = sshll.u32 (!%p182_p3), %s1413_s13, 4 }
  0x31   : > { %s188_s20 = scalar_lea.sflag (!%p182_p3), [#allocation3], %s1413_s13  ;;  %s191_s22 = scalar_lea.vmem (!%p182_p3), [#allocation2], %s792_s14 }
  0x37   : > { %1243 = dma.done.wait (%p1352_p6), %s188_s20, 256  }
  0x38   : > { %1245 = vsyncadd (%p1352_p6), %s188_s20, 4294967040  ;;  %v1423_v0 = vld [vmem:[%s191_s22] sm:$0xff]  ;;  %v1425_v1 = vld [vmem:[%s191_s22 + $0x8] sm:$0xff]  ;;  %s1269_s8 = smov 3   ;;  %s1270_s10 = smov 1   ;;  %vm276_vm0 = vcmask 916480   ;;  %v218_v7 = vlaneseq }
  0x39   : > { %v1094_v2 = vpack.i.bf16 %v1425_v1, %v1423_v0  ;;  %s1271_s11 = smov 2   ;;  %s1272_s12 = smov 127   ;;  %v262_v3 = vld [vmem:[%s1621_s1] sm:$0xff]  ;;  %v1442_v4 = vld [vmem:[%s1622_s2 + $0x8] sm:$0xff]  ;;  %v1275_v6 = vmov 0   ;;  %v967_v27 = vpack.c.bf16 %v1425_v1, %v1423_v0  ;;  %v808_v51 = vld [vmem:[%s1621_s1 + $0x10] sm:$0xff] }
  0x3a   : > { %s1273_s26 = smov 126   ;;  %s1274_s23 = smov 125   ;;  %903 = vmatprep.mubr.msk.f32.mxu0 %vm276_vm0, %v262_v3  ;;  %v1447_v5 = vld [vmem:[%s1622_s2] sm:$0xff]  ;;  %1125 = vset.pattern.permute.xlu1 %v1275_v6  ;;  %v219_v8 = vand.u32 127, %v218_v7  ;;  %v263_v40 = vld [vmem:[%s1621_s1 + $0x8] sm:$0xff]  ;;  %v1276_v52 = vmov 1  }
  0x3b   : > { %1095 = vrot.lane.b32.xlu0 %v1094_v2, %s1269_s8  ;;  %1105 = vrot.lane.b32.xlu1 %v1094_v2, %s1270_s10  ;;  %vm1278_vm13 = vmmov 0   ;;  %s1280_s29 = smov 112   ;;  %vm502_vm14 = vcmask 130048   ;;  %vm586_vm15 = vcmask 15360   ;;  %s836_s30 = sshll.u32 %s1330_s19, 8 }
  0x3c   : > { %1124 = vset.pattern.permute.xlu0 %v1275_v6  ;;  %vm220_vm1 = vcmp.ge.s32.totalorder %v219_v8, 3  ;;  %vm221_vm3 = vcmp.ge.s32.totalorder %v219_v8, 2  ;;  %vm222_vm4 = vcmp.ge.s32.totalorder %v219_v8, 1  ;;  %vm223_vm7 = vcmp.lt.s32.totalorder %v219_v8, 127  ;;  %934 = vmatprep.mubr.msk.f32.mxu1 %vm276_vm0, %v808_v51  ;;  %s1576_s7 = scalar_lea.hbm %s1624_s4, %s836_s30  ;;  %s699_s19 = scalar_lea.sflag [#allocation4], %s1413_s13 }
  0x3d   : > { %vm1453_vm2 = vmpackc.low %vm220_vm1, %vm220_vm1  ;;  %vm224_vm9 = vcmp.lt.s32.totalorder %v219_v8, 126  ;;  %vm225_vm11 = vcmp.lt.s32.totalorder %v219_v8, 125  ;;  %p1643_p11 = scmp.ne.s32.totalorder %s1628_s27, 0  ;;  %s1281_s9 = smov [#allocation5]  }
  0x3e   : > { %vm1461_vm5 = vmpackc.low %vm221_vm3, %vm221_vm3  ;;  %s1202_s20 = sshll.u32 %s1281_s9, 4  ;;  %s1203_s20 = int_to_ptr.vmem [resolvable:$false] %s1202_s20 }
  0x3f   : > { %1100 = vrot.lane.b32.xlu0 %v1094_v2, %s1271_s11  ;;  %1110 = vrot.lane.b32.xlu1 %v1094_v2, %s1272_s12  ;;  %vm1465_vm6 = vmpackc.low %vm222_vm4, %vm222_vm4  ;;  %s1204_s22 = scalar_lea.vmem %s1203_s20, 512 }
  0x40   : > { %vm1479_vm8 = vmpackc.low %vm223_vm7, %vm223_vm7 }
  0x41   : > { %vm1485_vm10 = vmpackc.low %vm224_vm9, %vm224_vm9 }
  0x42   : > { %vm1493_vm12 = vmpackc.low %vm225_vm11, %vm225_vm11 }
  0x43   : > { %1115 = vrot.lane.b32.xlu0 %v1094_v2, %s1273_s26  ;;  %1120 = vrot.lane.b32.xlu1 %v1094_v2, %s1274_s23 }
  0x47   : > { %273 = vperm.xlu1 %1125, %v1442_v4   ;;  %268 = vperm.xlu0 %1124, %v1447_v5  }
  0x4b   : > { %1157 = vset.pattern.permute.xlu0 %v1276_v52  ;;  %1156 = vset.pattern.permute.xlu1 %v1276_v52 }
  0xad   : > { %v1096_v9 = vpop.permute.xlu0 %1095  ;;  %v1106_v10 = vpop.permute.xlu1 %1105 }
  0xae   : > { %v1098_v11 = vunpack.i.h.bf16 %v1096_v9  ;;  %v1097_v12 = vunpack.i.l.bf16 %v1096_v9  ;;  %v1108_v15 = vunpack.i.h.bf16 %v1106_v10  ;;  %v1107_v16 = vunpack.i.l.bf16 %v1106_v10 }
  0xb0   : > { %v949_v14 = vpack.c.bf16 %v1098_v11, %v1097_v12  ;;  %v961_v22 = vpack.c.bf16 %v1108_v15, %v1107_v16 }
  0xb1   : > { %v1101_v17 = vpop.permute.xlu0 %1100  ;;  %v1111_v24 = vpop.permute.xlu1 %1110 }
  0xb2   : > { %v1103_v18 = vunpack.i.h.bf16 %v1101_v17  ;;  %v1102_v19 = vunpack.i.l.bf16 %v1101_v17  ;;  %951 = vmatprep.subr.msk.bf16.mxu0 %vm1453_vm2, %v949_v14  ;;  %v1113_v25 = vunpack.i.h.bf16 %v1111_v24  ;;  %v1112_v26 = vunpack.i.l.bf16 %v1111_v24  ;;  %v809_v17 = vld [vmem:[%s1621_s1 + $0x18] sm:$0xff] }
  0xb3   : > { %954 = vmatpush3.bf16.msk.msra.mxu0 %vm1453_vm2, %v949_v14 }
  0xb4   : > { %v955_v21 = vpack.c.bf16 %v1103_v18, %v1102_v19  ;;  %v971_v29 = vpack.c.bf16 %v1113_v25, %v1112_v26  ;;  %v1277_v26 = vmov 0.0|0.0  }
  0xb5   : > { %v1116_v28 = vpop.permute.xlu0 %1115  ;;  %v1121_v33 = vpop.permute.xlu1 %1120 }
  0xb6   : > { %957 = vmatprep.subr.msk.bf16.mxu0 %vm1461_vm5, %v955_v21  ;;  %v1118_v30 = vunpack.i.h.bf16 %v1116_v28  ;;  %v1117_v31 = vunpack.i.l.bf16 %v1116_v28  ;;  %v1123_v35 = vunpack.i.h.bf16 %v1121_v33  ;;  %v1122_v36 = vunpack.i.l.bf16 %v1121_v33  ;;  %v497_v28 = vld [vmem:[%s1623_s3] sm:$0x3] }
  0xb7   : > { %960 = vmatpush3.bf16.msk.msra.mxu0 %vm1461_vm5, %v955_v21 }
  0xb8   : > { %963 = vmatprep.subr.msk.bf16.mxu0 %vm1465_vm6, %v961_v22  ;;  %v977_v34 = vpack.c.bf16 %v1118_v30, %v1117_v31  ;;  %v983_v38 = vpack.c.bf16 %v1123_v35, %v1122_v36 }
  0xbb   : > { %966 = vmatpush3.bf16.msk.msra.mxu0 %vm1465_vm6, %v961_v22 }
  0xbc   : > { %968 = vmatprep.subr.bf16.mxu0 %v967_v27 }
  0xbf   : > { %970 = vmatpush3.bf16.msra.mxu0 %v967_v27  ;;  %v1279_v27 = vmov 0.0  }
  0xc0   : > { %973 = vmatprep.subr.msk.bf16.mxu0 %vm1479_vm8, %v971_v29 }
  0xc3   : > { %976 = vmatpush3.bf16.msk.msra.mxu0 %vm1479_vm8, %v971_v29 }
  0xc4   : > { %979 = vmatprep.subr.msk.bf16.mxu0 %vm1485_vm10, %v977_v34 }
  0xc6   : > { %v274_v41 = vpop.permute.xlu1 %273  ;;  %v269_v42 = vpop.permute.xlu0 %268 }
  0xc7   : > { %982 = vmatpush3.bf16.msk.msra.mxu0 %vm1485_vm10, %v977_v34 }
  0xc8   : > { %985 = vmatprep.subr.msk.bf16.mxu0 %vm1493_vm12, %v983_v38 }
  0xcb   : > { %988 = vmatpush3.bf16.msk.msra.mxu0 %vm1493_vm12, %v983_v38 }
  0xcc   : > { %1029 = vmatprep.subr.bf16.mxu0 %v1277_v26 }
  0xce   : > { %904 = vmatmul.mubr.msk.f32.vlgmr.msra.gmra.mrb[0].mxu0 %vm276_vm0, %v263_v40 }
  0xcf   : > { %941 = vmatprep.mubr.msk.f32.mxu0 %vm1278_vm13, %v1279_v27 }
 0x1a1   : > { %v905_v43 = vpop.f32.mrb[0].mxu0 }
 0x1a2   : > { %v355_v44 = vadd.f32 %v905_v43, %v274_v41  ;;  %v349_v45 = vpop.f32.mrb[1].mxu0 }
 0x1a3   : > { %v350_v46 = vadd.f32 %v349_v45, %v269_v42 }
 0x1a4   : > { %v359_v47 = vmax.f32 %v355_v44, 0.0 }
 0x1a5   : > { %v358_v48 = vmax.f32 %v350_v46, 0.0 }
 0x1a7   : > { %v1131_v49 = vpack.i.bf16 %v359_v47, %v358_v48  ;;  %v1007_v50 = vpack.c.bf16 %v359_v47, %v358_v48 }
 0x1a9   : > { %1132 = vrot.lane.b32.xlu0 %v1131_v49, %s1271_s11  ;;  %1127 = vrot.lane.b32.xlu1 %v1131_v49, %s1269_s8 }
 0x1ad   : > { %1142 = vrot.lane.b32.xlu0 %v1131_v49, %s1272_s12  ;;  %1137 = vrot.lane.b32.xlu1 %v1131_v49, %s1270_s10 }
 0x1b1   : > { %1152 = vrot.lane.b32.xlu0 %v1131_v49, %s1274_s23  ;;  %1147 = vrot.lane.b32.xlu1 %v1131_v49, %s1273_s26 }
 0x1b5   : > { %404 = vperm.xlu0 %1157, %v1442_v4   ;;  %400 = vperm.xlu1 %1156, %v1447_v5  }
 0x1b9   : > { %1159 = vset.pattern.permute.xlu0 %v1275_v6  ;;  %1158 = vset.pattern.permute.xlu1 %v1275_v6 }
 0x21b   : > { %v1133_v53 = vpop.permute.xlu0 %1132  ;;  %v1128_v54 = vpop.permute.xlu1 %1127 }
 0x21c   : > { %v1135_v55 = vunpack.i.h.bf16 %v1133_v53  ;;  %v1134_v56 = vunpack.i.l.bf16 %v1133_v53  ;;  %v1130_v57 = vunpack.i.h.bf16 %v1128_v54  ;;  %v1129_v58 = vunpack.i.l.bf16 %v1128_v54 }
 0x21e   : > { %v989_v59 = vpack.c.bf16 %v1130_v57, %v1129_v58  ;;  %v995_v61 = vpack.c.bf16 %v1135_v55, %v1134_v56 }
 0x21f   : > { %v1138_v60 = vpop.permute.xlu1 %1137  ;;  %v1143_v3 = vpop.permute.xlu0 %1142 }
 0x220   : > { %v1140_v62 = vunpack.i.h.bf16 %v1138_v60  ;;  %v1139_v63 = vunpack.i.l.bf16 %v1138_v60  ;;  %991 = vmatprep.subr.msk.bf16.mxu1 %vm1453_vm2, %v989_v59  ;;  %v1145_v6 = vunpack.i.h.bf16 %v1143_v3  ;;  %v1144_v7 = vunpack.i.l.bf16 %v1143_v3 }
 0x221   : > { %994 = vmatpush3.bf16.msk.msra.mxu1 %vm1453_vm2, %v989_v59 }
 0x222   : > { %997 = vmatprep.subr.msk.bf16.mxu1 %vm1461_vm5, %v995_v61  ;;  %v1001_v2 = vpack.c.bf16 %v1140_v62, %v1139_v63  ;;  %v1011_v9 = vpack.c.bf16 %v1145_v6, %v1144_v7 }
 0x223   : > { %v1148_v8 = vpop.permute.xlu1 %1147  ;;  %v1153_v12 = vpop.permute.xlu0 %1152 }
 0x224   : > { %v1150_v10 = vunpack.i.h.bf16 %v1148_v8  ;;  %v1149_v11 = vunpack.i.l.bf16 %v1148_v8  ;;  %v1155_v13 = vunpack.i.h.bf16 %v1153_v12  ;;  %v1154_v14 = vunpack.i.l.bf16 %v1153_v12 }
 0x225   : > { %1000 = vmatpush3.bf16.msk.msra.mxu1 %vm1461_vm5, %v995_v61 }
 0x226   : > { %1003 = vmatprep.subr.msk.bf16.mxu1 %vm1465_vm6, %v1001_v2  ;;  %v1017_v15 = vpack.c.bf16 %v1150_v10, %v1149_v11  ;;  %v1023_v16 = vpack.c.bf16 %v1155_v13, %v1154_v14 }
 0x229   : > { %1006 = vmatpush3.bf16.msk.msra.mxu1 %vm1465_vm6, %v1001_v2 }
 0x22a   : > { %1008 = vmatprep.subr.bf16.mxu1 %v1007_v50 }
 0x22d   : > { %1010 = vmatpush3.bf16.msra.mxu1 %v1007_v50 }
 0x22e   : > { %1013 = vmatprep.subr.msk.bf16.mxu1 %vm1479_vm8, %v1011_v9 }
 0x231   : > { %1016 = vmatpush3.bf16.msk.msra.mxu1 %vm1479_vm8, %v1011_v9 }
 0x232   : > { %1019 = vmatprep.subr.msk.bf16.mxu1 %vm1485_vm10, %v1017_v15 }
 0x234   : > { %v405_v18 = vpop.permute.xlu0 %404  ;;  %v401_v19 = vpop.permute.xlu1 %400 }
 0x235   : > { %1022 = vmatpush3.bf16.msk.msra.mxu1 %vm1485_vm10, %v1017_v15 }
 0x236   : > { %1025 = vmatprep.subr.msk.bf16.mxu1 %vm1493_vm12, %v1023_v16 }
 0x239   : > { %1028 = vmatpush3.bf16.msk.msra.mxu1 %vm1493_vm12, %v1023_v16 }
 0x23c   : > { %935 = vmatmul.mubr.msk.f32.vlgmr.msra.gmra.mrb[0].mxu1 %vm276_vm0, %v809_v17  ;;  %vm591_vm0 = vcmask 1041408  }
 0x30f   : > { %v936_v20 = vpop.f32.mrb[0].mxu1 }
 0x310   : > { %v1549_v21 = vadd.f32 %v936_v20, %v405_v18  ;;  %v479_v22 = vpop.f32.mrb[1].mxu1 }
 0x311   : > { %v1551_v23 = vadd.f32 %v479_v22, %v401_v19 }
 0x312   : > { %v489_v24 = vmax.f32 %v1549_v21, 0.0 }
 0x313   : > { %v488_v25 = vmax.f32 %v1551_v23, 0.0 }
 0x314   : > { %492 = vadd.xlane.f32.xlu0 %v489_v24  ;;  %v683_v53 = vadd.f32 %v489_v24, %v1425_v1 }
 0x315   : > { %490 = vadd.xlane.f32.xlu1 %v488_v25  ;;  %v682_v55 = vadd.f32 %v488_v25, %v1423_v0 }
 0x326   : > { %499 = vrot.lane.b32.xlu1 %v497_v28, %s1280_s29 }
 0x32a   : > { %576 = vrot.lane.b32.xlu0 %v1447_v5, %s1274_s23  ;;  %578 = vrot.lane.b32.xlu1 %v1442_v4, %s1274_s23 }
 0x32e   : > { %582 = vrot.lane.b32.xlu0 %v1442_v4, %s1273_s26  ;;  %580 = vrot.lane.b32.xlu1 %v1447_v5, %s1273_s26  ;;  %s215_s26 = scalar_lea.vmem [#allocation5], %s792_s14 }
 0x32f   : > { %s712_s23 = sshll.u32 %s215_s26, 4  ;;  %s1570_s23 = int_to_ptr.vmem [resolvable:$true] %s712_s23 }
 0x330   : > { %s1198_s14 = scalar_lea.vmem %s1570_s23, 256  ;;  %p1205_p8 = scmp.lt.s32.totalorder %s1570_s23, %s1203_s20 }
 0x331   : > { %p1199_p6 = scmp.ne.s32.totalorder %s1570_s23, %s1198_s14  ;;  %p1206_p10 = scmp.lt.s32.totalorder %s1204_s22, %s1198_s14 }
 0x333   : > { %p1200_p12 = pnand %p1199_p6, %p1643_p11  ;;  %p1207_p0 = por %p1206_p10, %p1205_p8 }
 0x335   : > { %p1201_p13 = pneg %p1200_p12 }
 0x337   : > { %p1208_p2 = pnand %p1207_p0, %p1201_p13 }
 0x3a1   : > { %v493_v29 = vpop.xlane.xlu0 %492 }
 0x3a2   : > { %v496_v30 = vmul.f32 0.0078125, %v493_v29  ;;  %v491_v31 = vpop.xlane.xlu1 %490 }
 0x3a3   : > { %v495_v32 = vmul.f32 0.0078125, %v491_v31 }
 0x3a5   : > { %v1030_v33 = vpack.c.bf16 %v496_v30, %v495_v32  ;;  %v577_v34 = vpop.permute.xlu0 %576 }
 0x3a6   : > { %946 = vmatprep.mubr.msk.f32.mxu1 %vm586_vm15, %v577_v34  ;;  %v500_v35 = vpop.permute.xlu1 %499 }
 0x3a7   : > { %1031 = vmatpush3.bf16.msra.mxu0 %v1030_v33 }
 0x3a9   : > { %v583_v5 = vpop.permute.xlu0 %582 }
 0x3aa   : > { %942 = vmatmul.mubr.msk.f32.vlgmr.msra.gmra.mrb[2].mxu0 %vm502_vm14, %v497_v28  ;;  %v579_v39 = vpop.permute.xlu1 %578 }
 0x3ae   : > { %v581_v40 = vpop.permute.xlu1 %580 }
 0x47d   : > { %v571_v36 = vpop.f32.mrb[2].mxu0 }
 0x47e   : > { %v572_v37 = vadd.f32 %v571_v36, %v500_v35  ;;  %v943_v38 = vpop.f32.mrb[3].mxu0 }
 0x480   : > { %v575_v4 = vmax.f32 %v572_v37, 0.0 }
 0x482   : > { %944 = vmatprep.subr.msk.mxu1 %vm591_vm0, %v575_v4 }
 0x483   : > { %945 = vmatpush3.msk.msra.mxu1 %vm591_vm0, %v575_v4 }
 0x484   : > { %947 = vmatmul.mubr.msk.f32.vlgmr.msra.gmra.mrb[2].mxu1 %vm586_vm15, %v579_v39 }
 0x557   : > { %v948_v41 = vpop.f32.mrb[2].mxu1 }
 0x558   : > { %v667_v42 = vadd.f32 %v948_v41, %v583_v5  ;;  %v661_v43 = vpop.f32.mrb[3].mxu1 }
 0x559   : > { %v662_v44 = vadd.f32 %v661_v43, %v581_v40 }
 0x55a   : > { %v829_v45 = vmul.f32 -1.442695, %v667_v42 }
 0x55b   : > { %v828_v46 = vmul.f32 -1.442695, %v662_v44 }
 0x55c   : > { %1160 = vpow2.f32 %v829_v45 }
 0x55d   : > { %1162 = vpow2.f32 %v828_v46 }
 0x566   : > { %v1161_v47 = vpop.eup %1160 }
 0x567   : > { %v1163_v48 = vpop.eup %1162  ;;  %v677_v49 = vadd.f32 1.0, %v1161_v47 }
 0x568   : > { %v676_v50 = vadd.f32 1.0, %v1163_v48 }
 0x569   : > { %1164 = vrcp.f32 %v677_v49 }
 0x56a   : > { %1166 = vrcp.f32 %v676_v50 }
 0x573   : > { %v1165_v51 = vpop.eup %1164 }
 0x574   : > { %v1167_v52 = vpop.eup %1166  ;;  %691 = vperm.xlu0 %1159, %v1165_v51  }
 0x575   : > { %686 = vperm.xlu1 %1158, %v1167_v52  }
 0x5f3   : > { %v692_v54 = vpop.permute.xlu0 %691 }
 0x5f4   : > { %v695_v56 = vadd.f32 %v692_v54, %v683_v53  ;;  %v687_v57 = vpop.permute.xlu1 %686 }
 0x5f5   : > { %v694_v58 = vadd.f32 %v687_v57, %v682_v55 }
 0x5f6   : > { %697 = vst [vmem:[%s215_s26 + $0x8] sm:$0xff] %v695_v56 }
 0x5f7   : > { %696 = vst [vmem:[%s215_s26] sm:$0xff] %v694_v58 }
 0x5f8   : > { %1211 = shalt.err (!%p1208_p2)
}
 0x5f9   : > { %s1212_s25 = scalar_lea.hbm %s1576_s7, 256  ;;  %s1216_s11 = scalar_lea.hbm %s1624_s4, 512 }
 0x5fa   : > { %p1213_p4 = scmp.ne.s32.totalorder %s1576_s7, %s1212_s25  ;;  %p1217_p9 = scmp.lt.u32.totalorder %s1576_s7, %s1624_s4 }
 0x5fb   : > { %p1218_p1 = scmp.lt.u32.totalorder %s1216_s11, %s1212_s25  ;;  %p1220_p6 = scmp.lt.u32.totalorder %s1212_s25, %s1576_s7 }
 0x5fc   : > { %p1214_p5 = pnand %p1213_p4, %p1643_p11 }
 0x5fd   : > { %p1219_p3 = por %p1218_p1, %p1217_p9 }
 0x5fe   : > { %p1215_p7 = pneg %p1214_p5 }
 0x5ff   : > { %p1221_p12 = por %p1220_p6, %p1219_p3 }
 0x601   : > { %p1222_p13 = pnand %p1221_p12, %p1215_p7 }
 0x603   : > { %1225 = shalt.err (!%p1222_p13)
}
 0x604   : > { %s1282_s26 = smov 128   ;;  %s1283_s30 = smov 8  }
 0x605   : > { %1034 = dma.vmem_to_hbm [thread:$0]  (%p1643_p11), %s1570_s23, 256, %s1576_s7, %s699_s19, %s1282_s26, %s1282_s26, %s1283_s30  }
 0x606 PF: > { %s727_s5 = sand.u32 1, %s1252_s15   ;;  %p1644_p8 = scmp.ne.s32.totalorder %s1629_s28, 0 }
 0x607   : > { %p1645_p10 = scmp.ge.s32.totalorder %s1264_s18, 2  ;;  %s728_s6 = scalar_lea.sflag [#allocation4], %s727_s5 }
 0x609   : > { %p1041_p0 = pnand %p1645_p10, %p1644_p8 }
 0x60b   : > { %1247 = dma.done.wait (!%p1041_p0), %s728_s6, 256  }
 0x60c   : > { %1249 = vsyncadd (!%p1041_p0), %s728_s6, 4294967040  ;;  %p17_p2 = scmp.ge.s32.totalorder %s1334_s21, 4   ;;  %s1646_s15 = smov %s1256_s16 }
 0x60d   : > { %s1647_s16 = smov %s1260_s17  ;;  %s1648_s17 = smov %s1346_s24 }
 0x60e   : > { %s1649_s18 = smov %s1334_s21  ;;  %19 = sbr.rel (!%p17_p2) target bundleno = 5 (0x5), region = 82 }
 0x615   :  { %733 = vsyncpa [#allocation3], 1 }
 0x616   :  { %735 = vsyncpa [#allocation3 + $0x1], 1 }
 0x617   :  { %736 = vsyncpa [#allocation4], 1 }
 0x618   :  { %738 = vsyncpa [#allocation4 + $0x1], 1 }

</bundles_post_ra>
